<compile_context>
chip_gen: v7x
topology: tpu7x:2x2x1
jax: 0.10.0
libtpu: 0.0.40
codegen_flags: <defaults>
</compile_context>

<pallas_src>
import jax
import jax.numpy as jnp
import numpy as np
from jax import lax
from jax.experimental import pallas as pl
from jax.experimental.pallas import tpu as pltpu


def _round_up(x, m):
    return (x + m - 1) // m * m


def _tpu_vmem_capacity_bytes():
    """Physical VMEM per TensorCore; conservative fallback = 64 MiB (v7x)."""
    default = 64 * 1024 * 1024
    try:
        info = pltpu.get_tpu_info()
    except Exception:
        return default
    for attr in ("vmem_capacity_bytes", "vmem_bytes", "vmem_size_bytes"):
        v = getattr(info, attr, None)
        if v:
            return int(v)
    return default


def _plan(n_pad, e_pad, e_out, out_itemsize):
    """Pick (row_tile, vmem_limit_bytes), generation-aware.

    row_tile = rows of the (N, N) pair matrix handled per grid step.  The fit
    check counts the x2 double-buffer factor for every per-step streamed block
    (out + spat + a_i) against ~1/10 of physical VMEM, so tiles grow to the
    largest aligned divisor that fits (bigger DMA bursts, fewer ~0.35 us grid
    steps) while leaving plenty of headroom for the resident b/q/weight blocks.
    """
    cap = _tpu_vmem_capacity_bytes()
    stream_budget = cap // 10
    per_row = 2 * (n_pad * e_out * out_itemsize   # out block  (double-buffered)
                   + n_pad * 8 * 4                # spat block (double-buffered)
                   + e_pad * 4)                   # a_i block  (double-buffered)
    cands = [d for d in range(8, n_pad + 1, 8) if n_pad % d == 0]
    fits = [d for d in cands if d * per_row <= stream_budget]
    ti = max(fits) if fits else min(cands)
    vmem_limit = min(cap * 3 // 4, cap - (8 << 20))   # ~96 MiB v5e/v6e, ~48 MiB v7x
    return ti, int(vmem_limit)


# ----------------------------- Pallas kernel --------------------------------
def edge_feat_mul_kernel(a_ref, b_ref, spat_ref, q_ref, wj3_ref, out_ref):
    """One (batch b, i-row-tile) grid step; both grid axes are parallel.

      out[b, i0:i0+TI, :, :E] = relu(a_i + b_j + s_ij) * q_b
        a_i  = h_i @ Wj1 + bj         (wrapper precompute, per-i-tile block)
        b_j  = h_j @ Wj2              (wrapper precompute, per-batch block)
        s_ij = spatial_ij @ Wj3       (computed here; K=8 MXU pass, MXU has slack)
        q_b  = relu(cond_b @ Wq + bq) (wrapper precompute)

    Compute is lane-dense at e_pad width; only the first E lanes are stored so
    HBM writes equal the logical output bytes (unmasked vst when E % 128 == 0).
    The module's trailing ReLU is an identity (both factors are >= 0).
    """
    ti = out_ref.shape[1]
    n_pad = out_ref.shape[2]
    e_out = out_ref.shape[3]
    e_pad = a_ref.shape[2]

    # Spatial part of the joint projection for this i-tile.  spat was
    # pre-flattened to 2-D in the wrapper; the row split below is
    # sublane-aligned (n_pad % 8 == 0) and therefore layout-free.
    s = jnp.dot(spat_ref[0], wj3_ref[...],
                preferred_element_type=jnp.float32).reshape(ti, n_pad, e_pad)

    joint = jnp.maximum(a_ref[0][:, None, :] + b_ref[0][None, :, :] + s, 0.0)
    res = joint * q_ref[0]                       # (ti, n_pad, e_pad) * (1, e_pad)
    out_ref[0] = res[:, :, :e_out].astype(out_ref.dtype)


# ------------------------------ JAX wrapper ----------------------------------
def edge_feat_mul(node_feats, spatial_feats, cond_feats, params,
                  out_dtype=jnp.float32):
    B, N, Dn = node_feats.shape
    E = params["bn"].shape[-1]

    n_pad = _round_up(N, 8)      # sublane-aligned pair axis
    e_pad = _round_up(E, 128)    # lane-dense *compute* width; output keeps last dim E

    wj = params["wj"]            # (E, 2E + 8), n2n_method == 'cat'
    hi = lax.Precision.HIGHEST   # keep f32 semantics for the 1e-5 check

    # ---- per-node precompute hoisted to XLA (tiny next to the edge stream) ----
    h = jax.nn.relu(jnp.matmul(node_feats, params["wn"].T, precision=hi)
                    + params["bn"])                                    # (B, N, E)
    a = jnp.matmul(h, wj[:, :E].T, precision=hi) + params["bj"]        # h_i term (+ joint bias)
    bterm = jnp.matmul(h, wj[:, E:2 * E].T, precision=hi)              # h_j term
    q = jax.nn.relu(jnp.matmul(cond_feats, params["wq"].T, precision=hi)
                    + params["bq"])                                    # (B, E)

    # ---- pad (padded rows/cols are exact zeros; padded outputs are sliced off) ----
    a_p = jnp.pad(a, ((0, 0), (0, n_pad - N), (0, e_pad - E)))
    b_p = jnp.pad(bterm, ((0, 0), (0, n_pad - N), (0, e_pad - E)))
    q_p = jnp.pad(q, ((0, 0), (0, e_pad - E))).reshape(B, 1, e_pad)
    wj3_t = jnp.pad(wj[:, 2 * E:], ((0, e_pad - E), (0, 0))).T          # (8, e_pad)
    spat_p = jnp.pad(spatial_feats,
                     ((0, 0), (0, n_pad - N), (0, n_pad - N), (0, 0)))
    spat_p = spat_p.reshape(B, n_pad * n_pad, 8)   # pre-flattened 2-D DMA tiles

    out_itemsize = np.dtype(out_dtype).itemsize
    ti, vmem_limit = _plan(n_pad, e_pad, E, out_itemsize)
    n_i_tiles = n_pad // ti
    grid = (B, n_i_tiles)

    # Advisory cost estimate so XLA overlaps the small precompute matmuls /
    # padding above with the kernel instead of serializing.
    edges = B * n_pad * n_pad
    cost = pl.CostEstimate(
        flops=int(edges * (2 * 8 + 4) * e_pad),
        transcendentals=0,
        bytes_accessed=int(edges * (E * out_itemsize + 8 * 4)
                           + B * n_pad * e_pad * 4 * (1 + n_i_tiles)
                           + B * e_pad * 4 + 8 * e_pad * 4),
    )

    out = pl.pallas_call(
        edge_feat_mul_kernel,
        out_shape=jax.ShapeDtypeStruct((B, n_pad, n_pad, E), out_dtype),
        grid=grid,
        in_specs=[
            pl.BlockSpec((1, ti, e_pad), lambda b, i: (b, i, 0)),         # a_i tile
            pl.BlockSpec((1, n_pad, e_pad), lambda b, i: (b, 0, 0)),      # b_j (per batch)
            pl.BlockSpec((1, ti * n_pad, 8), lambda b, i: (b, i, 0)),     # spatial tile
            pl.BlockSpec((1, 1, e_pad), lambda b, i: (b, 0, 0)),          # q (precomputed)
            pl.BlockSpec((8, e_pad), lambda b, i: (0, 0)),                # Wj3
        ],
        # NOTE: if xprof ever shows exposed output-store DMA at large tiles,
        # sweep pipeline_mode=pl.Buffered(3) on this out_spec.
        out_specs=pl.BlockSpec((1, ti, n_pad, E), lambda b, i: (b, i, 0, 0)),
        compiler_params=pltpu.CompilerParams(
            dimension_semantics=("parallel", "parallel"),
            vmem_limit_bytes=vmem_limit),
        cost_estimate=cost,
    )(a_p, b_p, spat_p, q_p, wj3_t)

    # E is unpadded; the N slice is a zero-copy view whenever N % 8 == 0.
    return out[:, :N, :N, :].reshape(B * N * N, E)


# --------------------------- parameter construction --------------------------
def _weight_norm(v, g):
    # nn.utils.weight_norm default dim=0: per-output-row norm over the input dim.
    norm = jnp.sqrt(jnp.sum(v * v, axis=1, keepdims=True))
    return g * v / norm


def make_params(key, node_dim, cond_dim, edge_dim):
    ks = jax.random.split(key, 6)

    def lin(kw, kg, out_d, in_d):
        v = jax.random.normal(kw, (out_d, in_d), jnp.float32) * 0.1
        g = 1.0 + 0.1 * jax.random.uniform(kg, (out_d, 1), jnp.float32)
        return _weight_norm(v, g)

    wn = lin(ks[0], ks[1], edge_dim, node_dim)
    wj = lin(ks[2], ks[3], edge_dim, 2 * edge_dim + 8)   # n2n_method == 'cat'
    wq = lin(ks[4], ks[5], edge_dim, cond_dim)
    bn = jnp.linspace(-0.05, 0.05, edge_dim, dtype=jnp.float32)
    bj = jnp.linspace(0.05, -0.05, edge_dim, dtype=jnp.float32)
    bq = jnp.linspace(-0.02, 0.02, edge_dim, dtype=jnp.float32)
    return dict(wn=wn, bn=bn, wj=wj, bj=bj, wq=wq, bq=bq)


# --------------------------- pure-JAX reference ------------------------------
def ref_forward(node_feats, spatial_feats, cond_feats, p):
    # dropout is identity (p=0.0 / eval); node_dim % 512 != 4 so no coord concat.
    # TODO(synk): graph.edge.attr_process is not defined in the snippet; treated as identity.
    hi = lax.Precision.HIGHEST
    h = jax.nn.relu(jnp.matmul(node_feats, p["wn"].T, precision=hi) + p["bn"])
    B, N, E = h.shape
    a = jnp.broadcast_to(h[:, :, None, :], (B, N, N, E))
    b = jnp.broadcast_to(h[:, None, :, :], (B, N, N, E))
    joint_in = jnp.concatenate([a, b, spatial_feats], axis=-1).reshape(B * N * N, -1)
    joint = jax.nn.relu(jnp.matmul(joint_in, p["wj"].T, precision=hi) + p["bj"])
    q = jax.nn.relu(jnp.matmul(cond_feats, p["wq"].T, precision=hi) + p["bq"])
    edge = joint.reshape(B, N * N, E) * q[:, None, :]
    return jax.nn.relu(edge.reshape(B * N * N, E))


# ---------------------------------- main --------------------------------------
if __name__ == "__main__":
    B, N = 2, 8
    node_dim, cond_dim, edge_dim = 32, 32, 32

    key = jax.random.PRNGKey(0)
    k1, k2, k3, kp = jax.random.split(key, 4)
    node_feats = jax.random.normal(k1, (B, N, node_dim), jnp.float32)
    spatial_feats = jax.random.normal(k2, (B, N, N, 8), jnp.float32)
    cond_feats = jax.random.normal(k3, (B, cond_dim), jnp.float32)
    params = make_params(kp, node_dim, cond_dim, edge_dim)

    out = edge_feat_mul(node_feats, spatial_feats, cond_feats, params)
    out = jax.block_until_ready(out)

    ref = ref_forward(node_feats, spatial_feats, cond_feats, params)
    np.testing.assert_allclose(np.asarray(out), np.asarray(ref), rtol=1e-5, atol=1e-5)

    print("KERNEL_OK")
</pallas_src>

<mosaic_0001>
module attributes {stable_mosaic.version = 11 : i64} {
  func.func @edge_feat_mul_kernel(%arg0: i32, %arg1: i32, %arg2: memref<1x8x128xf32, #tpu.memory_space<vmem>>, %arg3: memref<1x8x128xf32, #tpu.memory_space<vmem>>, %arg4: memref<1x64x8xf32, #tpu.memory_space<vmem>>, %arg5: memref<1x1x128xf32, #tpu.memory_space<vmem>>, %arg6: memref<8x128xf32, #tpu.memory_space<vmem>>, %arg7: memref<1x8x8x32xf32, #tpu.memory_space<vmem>>) attributes {dimension_semantics = [#tpu.dimension_semantics<parallel>, #tpu.dimension_semantics<parallel>], iteration_bounds = array<i64: 2, 1>, scalar_prefetch = 0 : i64, scratch_operands = 0 : i64, tpu.core_type = #tpu.core_type<tc>, window_params = [{transform_indices = @transform_0, window_bounds = array<i64: 1, 8, 128>}, {transform_indices = @transform_1, window_bounds = array<i64: 1, 8, 128>}, {transform_indices = @transform_2, window_bounds = array<i64: 1, 64, 8>}, {transform_indices = @transform_3, window_bounds = array<i64: 1, 1, 128>}, {pipeline_mode = #tpu.pipeline_mode<synchronous>, transform_indices = @transform_4, window_bounds = array<i64: 8, 128>}, {transform_indices = @transform_5, window_bounds = array<i64: 1, 8, 8, 32>}]} {
    %c0 = arith.constant 0 : index
    %c0_0 = arith.constant 0 : index
    %c0_1 = arith.constant 0 : index
    %0 = vector.load %arg4[%c0, %c0_0, %c0_1] : memref<1x64x8xf32, #tpu.memory_space<vmem>>, vector<1x64x8xf32>
    %1 = vector.shape_cast %0 : vector<1x64x8xf32> to vector<64x8xf32>
    %c0_2 = arith.constant 0 : index
    %c0_3 = arith.constant 0 : index
    %2 = vector.load %arg6[%c0_2, %c0_3] : memref<8x128xf32, #tpu.memory_space<vmem>>, vector<8x128xf32>
    %cst = arith.constant dense<0.000000e+00> : vector<64x128xf32>
    %3 = tpu.matmul %1, %2, %cst {dimension_numbers = #tpu.dot_dimension_numbers<[1], [0], [0], [1], [0, 0, 1, 1], [], []>} : vector<64x8xf32>, vector<8x128xf32>, vector<64x128xf32> -> vector<64x128xf32>
    %4 = vector.shape_cast %3 : vector<64x128xf32> to vector<8x8x128xf32>
    %c0_4 = arith.constant 0 : index
    %c0_5 = arith.constant 0 : index
    %c0_6 = arith.constant 0 : index
    %5 = vector.load %arg2[%c0_4, %c0_5, %c0_6] : memref<1x8x128xf32, #tpu.memory_space<vmem>>, vector<1x8x128xf32>
    %6 = vector.shape_cast %5 : vector<1x8x128xf32> to vector<8x128xf32>
    %7 = vector.shape_cast %6 : vector<8x128xf32> to vector<8x1x128xf32>
    %c0_7 = arith.constant 0 : index
    %c0_8 = arith.constant 0 : index
    %c0_9 = arith.constant 0 : index
    %8 = vector.load %arg3[%c0_7, %c0_8, %c0_9] : memref<1x8x128xf32, #tpu.memory_space<vmem>>, vector<1x8x128xf32>
    %9 = vector.shape_cast %8 : vector<1x8x128xf32> to vector<8x128xf32>
    %10 = vector.shape_cast %9 : vector<8x128xf32> to vector<1x8x128xf32>
    %11 = vector.broadcast %7 : vector<8x1x128xf32> to vector<8x8x128xf32>
    %12 = vector.broadcast %10 : vector<1x8x128xf32> to vector<8x8x128xf32>
    %13 = arith.addf %11, %12 : vector<8x8x128xf32>
    %14 = arith.addf %13, %4 : vector<8x8x128xf32>
    %cst_10 = arith.constant 0.000000e+00 : f32
    %15 = vector.broadcast %cst_10 : f32 to vector<8x8x128xf32>
    %16 = arith.maximumf %14, %15 : vector<8x8x128xf32>
    %c0_11 = arith.constant 0 : index
    %c0_12 = arith.constant 0 : index
    %c0_13 = arith.constant 0 : index
    %17 = vector.load %arg5[%c0_11, %c0_12, %c0_13] : memref<1x1x128xf32, #tpu.memory_space<vmem>>, vector<1x1x128xf32>
    %18 = vector.shape_cast %17 : vector<1x1x128xf32> to vector<1x128xf32>
    %19 = vector.shape_cast %18 : vector<1x128xf32> to vector<1x1x128xf32>
    %20 = vector.broadcast %19 : vector<1x1x128xf32> to vector<8x8x128xf32>
    %21 = arith.mulf %16, %20 : vector<8x8x128xf32>
    %22 = vector.extract_strided_slice %21 {offsets = [0, 0, 0], sizes = [8, 8, 32], strides = [1, 1, 1]} : vector<8x8x128xf32> to vector<8x8x32xf32>
    %c0_14 = arith.constant 0 : index
    %c0_15 = arith.constant 0 : index
    %c0_16 = arith.constant 0 : index
    %c0_17 = arith.constant 0 : index
    %23 = vector.load %arg7[%c0_14, %c0_15, %c0_16, %c0_17] : memref<1x8x8x32xf32, #tpu.memory_space<vmem>>, vector<1x8x8x32xf32>
    %24 = vector.shape_cast %23 : vector<1x8x8x32xf32> to vector<8x8x32xf32>
    %25 = vector.shape_cast %22 : vector<8x8x32xf32> to vector<1x8x8x32xf32>
    tpu.vector_store %arg7[%c0_14, %c0_15, %c0_16, %c0_17], %25 {strides = array<i32>} : memref<1x8x8x32xf32, #tpu.memory_space<vmem>>, vector<1x8x8x32xf32>,
    return
  }
  func.func @transform_0(%arg0: i32, %arg1: i32) -> (i32, i32, i32) {
    %c0_i32 = arith.constant 0 : i32
    %c0_i32_0 = arith.constant 0 : i32
    return %arg0, %arg1, %c0_i32 : i32, i32, i32
  }
  func.func @transform_1(%arg0: i32, %arg1: i32) -> (i32, i32, i32) {
    %c0_i32 = arith.constant 0 : i32
    %c0_i32_0 = arith.constant 0 : i32
    %c0_i32_1 = arith.constant 0 : i32
    return %arg0, %c0_i32, %c0_i32_0 : i32, i32, i32
  }
  func.func @transform_2(%arg0: i32, %arg1: i32) -> (i32, i32, i32) {
    %c0_i32 = arith.constant 0 : i32
    %c0_i32_0 = arith.constant 0 : i32
    return %arg0, %arg1, %c0_i32 : i32, i32, i32
  }
  func.func @transform_3(%arg0: i32, %arg1: i32) -> (i32, i32, i32) {
    %c0_i32 = arith.constant 0 : i32
    %c0_i32_0 = arith.constant 0 : i32
    %c0_i32_1 = arith.constant 0 : i32
    return %arg0, %c0_i32, %c0_i32_0 : i32, i32, i32
  }
  func.func @transform_4(%arg0: i32, %arg1: i32) -> (i32, i32) {
    %c0_i32 = arith.constant 0 : i32
    %c0_i32_0 = arith.constant 0 : i32
    %c0_i32_1 = arith.constant 0 : i32
    return %c0_i32, %c0_i32_0 : i32, i32
  }
  func.func @transform_5(%arg0: i32, %arg1: i32) -> (i32, i32, i32, i32) {
    %c0_i32 = arith.constant 0 : i32
    %c0_i32_0 = arith.constant 0 : i32
    %c0_i32_1 = arith.constant 0 : i32
    return %arg0, %arg1, %c0_i32, %c0_i32_0 : i32, i32, i32, i32
  }
}

</mosaic_0001>

<bundles_post_ra>
// kernel: tpu_custom_call.1
= control target key start
LH: loop header
LB: loop body
LE: loop exit
PB: predicated region body
PF: predicated region fallthrough
CT: control target
= control target key end

     0   :  { %10 = vsyncpa [#allocation3], 0  ;;  %s1101_s0 = inlined_call_operand.vmem [shape: f32[2,8,128], index: 0, kind: input, shape index: {}]   ;;  %s1102_s1 = inlined_call_operand.vmem [shape: f32[2,8,128], index: 1, kind: input, shape index: {}]   ;;  %s1103_s2 = inlined_call_operand.vmem [shape: f32[2,64,8], index: 2, kind: input, shape index: {}]   ;;  %s1104_s3 = inlined_call_operand.vmem [shape: f32[2,1,128], index: 3, kind: input, shape index: {}]   ;;  %s1105_s4 = inlined_call_operand.vmem [shape: f32[8,128], index: 4, kind: input, shape index: {}]   ;;  %s1106_s5 = inlined_call_operand.hbm [shape: f32[2,8,8,32], index: 5, kind: output, shape index: {}]  }
   0x1   :  { %12 = vsyncpa [#allocation3 + $0x1], 0  ;;  %s946_s18 = smov 0   ;;  %s948_s19 = smov 0  }
   0x2   :  { %s950_s20 = smov 0   ;;  %s952_s21 = smov 0  }
   0x3   :  { %s954_s22 = smov 0   ;;  %s956_s23 = smov 0  }
   0x4 LB: > { %s723_s24 = sadd.s32 4294967295, %s910_s23   ;;  %s724_s25 = sadd.s32 4294967294, %s910_s23   ;;  %s910_s23 = sphi %s956_s23, %s18_s23   ;;  %s906_s22 = sphi %s954_s22, %s1113_s22   ;;  %s902_s21 = sphi %s952_s21, %s1112_s21   ;;  %s898_s20 = sphi %s950_s20, %s1111_s20   ;;  %s894_s19 = sphi %s948_s19, %s1110_s19   ;;  %s890_s18 = sphi %s946_s18, %s1109_s18  }
   0x5   : > { %s30_s26 = sadd.s32 1, %s906_s22  ;;  %s168_s27 = sadd.s32 1, %s898_s20 }
   0x6   : > { %p32_p0 = scmp.ge.s32.totalorder %s30_s26, 2  ;;  %p178_p1 = scmp.ne.s32.totalorder %s898_s20, %s894_s19 }
   0x7   : > { %p179_p2 = scmp.eq.s32.totalorder %s723_s24, 1  ;;  %p184_p3 = scmp.ne.s32.totalorder %s894_s19, %s890_s18 }
   0x8   : > { %s1115_s26 = smov (%p32_p0, %s30_s26), 0  ;;  %p185_p5 = scmp.eq.s32.totalorder %s724_s25, 1 }
   0x9   : > { %p986_p4 = por %p179_p2, %p178_p1  ;;  %s163_s29 = ssub.s32 %s906_s22, %s1115_s26 }
   0xa   : > { %p727_p6 = scmp.ge.s32.totalorder %s910_s23, 1  ;;  %p166_p7 = scmp.eq.s32.totalorder %s163_s29, 0 }
   0xb   : > { %p993_p8 = por %p185_p5, %p184_p3  ;;  %p242_p9 = scmp.lt.s32.totalorder %s910_s23, 3 }
   0xc   : > { %s999_s6 = scalar_select %p166_p7, %s898_s20, %s168_s27  }
   0xd   : > { %p243_p10 = pnand %p727_p6, %p242_p9 }
   0xe   : > { %v321_v0 = vld [vmem:[%s1105_s4] sm:$0xff] (!%p243_p10)  ;;  %p288_p11 = scmp.lt.s32.totalorder (!%p243_p10), %s902_s21, 1  ;;  %vm322_vm0 = vcmask (!%p243_p10), 64512   ;;  %v912_v9 = vmov (!%p243_p10), 1966171168   ;;  %v458_v11 = vlaneseq (!%p243_p10)  ;;  %s285_s29 = sand.u32 (!%p243_p10), 1, %s894_s19  }
   0xf   : > { %246 = sbr.rel (%p243_p10) target bundleno = 267 (0x10b), region = 40  ;;  %758 = vmatprep.subr.mxu0 (!%p243_p10), %v321_v0  ;;  %772 = vmatprep.subr.mxu1 (!%p243_p10), %v321_v0  ;;  %v456_v10 = vunpack.c.l.s4 (!%p243_p10), %v912_v9  ;;  %s1034_s11 = sshll.u32 (!%p243_p10), %s285_s29, 6  ;;  %vm583_vm1 = vcmask (!%p243_p10), 261120  }
  0x10   : > { %759 = vmatpush3.msra.mxu0 (!%p243_p10), %v321_v0  ;;  %773 = vmatpush3.msra.mxu1 (!%p243_p10), %v321_v0  ;;  %v459_v13 = vshrl.u32 (!%p243_p10), %v458_v11, 7  ;;  %s287_s12 = scalar_lea.vmem (!%p243_p10), [#allocation2], %s1034_s11  ;;  %s1055_s16 = scalar_lea.sflag (!%p243_p10), [#allocation3], %s285_s29 }
  0x11   : > { %v457_v12 = vunpack.c.0.s8 (!%p243_p10), %v456_v10  ;;  %s913_s24 = smov (!%p243_p10), [#allocation2]  }
  0x12   : > { %v506_v22 = vsub.s32 (!%p243_p10), 0, %v459_v13  ;;  %s836_s25 = sshll.u32 (!%p243_p10), %s913_s24, 4  ;;  %s837_s25 = int_to_ptr.vmem [resolvable:$false] %s836_s25 }
  0x13   : > { %v460_v15 = vsub.s32 (!%p243_p10), %v457_v12, %v459_v13 }
  0x16   : > { %s1006_s9 = scalar_select %p288_p11, %s902_s21, 1 }
  0x18   : > { %s747_s10 = sshll.u32 %s1006_s9, 6  ;;  %s729_s14 = sshll.u32 %s1006_s9, 3 }
  0x19   : > { %s307_s13 = scalar_lea.vmem %s1103_s2, %s747_s10  ;;  %s294_s17 = scalar_lea.vmem %s1101_s0, %s729_s14 }
  0x1a   : > { %v313_v1 = vld [vmem:[%s307_s13] sm:$0xff]  ;;  %v314_v3 = vld [vmem:[%s307_s13 + $0x8] sm:$0xff]  ;;  %v315_v5 = vld [vmem:[%s307_s13 + $0x10] sm:$0xff]  ;;  %s298_s27 = scalar_lea.vmem %s1102_s1, %s729_s14  ;;  %s311_s10 = scalar_lea.vmem %s1104_s3, %s1006_s9 }
  0x1b   : > { %v317_v2 = vld [vmem:[%s307_s13 + $0x20] sm:$0xff]  ;;  %760 = vmatprep.mubr.msk.f32.mxu0 %vm322_vm0, %v313_v1  ;;  %v318_v4 = vld [vmem:[%s307_s13 + $0x28] sm:$0xff]  ;;  %v319_v6 = vld [vmem:[%s307_s13 + $0x30] sm:$0xff]  ;;  %s748_s9 = sshll.u32 %s902_s21, 10 }
  0x1c   : > { %766 = vmatprep.mubr.msk.f32.mxu1 %vm322_vm0, %v317_v2  ;;  %761 = vmatmul.mubr.msk.f32.vlgmr.msra.gmra.mrb[0].mxu0 %vm322_vm0, %v314_v3  ;;  %v316_v7 = vld [vmem:[%s307_s13 + $0x18] sm:$0xff]  ;;  %v452_v14 = vld [vmem:[%s294_s17] sm:$0xff]  ;;  %s1045_s15 = scalar_lea.hbm %s1106_s5, %s748_s9 }
  0x1d   : > { %767 = vmatmul.mubr.msk.f32.vlgmr.msra.gmra.mrb[0].mxu1 %vm322_vm0, %v318_v4  ;;  %763 = vmatprep.mubr.msk.f32.mxu0 %vm322_vm0, %v315_v5  ;;  %v320_v8 = vld [vmem:[%s307_s13 + $0x38] sm:$0xff]  ;;  %v454_v16 = vcombine.high %v452_v14, %v452_v14  ;;  %v461_v17 = vrot.slane %v452_v14, %v460_v15  ;;  %v503_v30 = vld [vmem:[%s298_s27] sm:$0xff]  ;;  %s608_s13 = sshll.u32 %s287_s12, 4  ;;  %s838_s27 = scalar_lea.vmem %s837_s25, 2048  ;;  %s1047_s13 = int_to_ptr.vmem [resolvable:$true] %s608_s13 }
  0x1e   : > { %769 = vmatprep.mubr.msk.f32.mxu1 %vm322_vm0, %v319_v6  ;;  %v741_v51 = vld [vmem:[%s311_s10] ss:$0 sm:$0xff]  ;;  %s832_s17 = scalar_lea.vmem %s1047_s13, 1024  ;;  %p839_p1 = scmp.lt.s32.totalorder %s1047_s13, %s837_s25 }
  0x1f   : > { %v468_v18 = vrot.slane %v454_v16, %v460_v15  ;;  %v469_v19 = vcombine.high %v461_v17, %v461_v17  ;;  %v477_v24 = vrot.slane %v461_v17, %v460_v15  ;;  %p833_p12 = scmp.ne.s32.totalorder %s1047_s13, %s832_s17  ;;  %p840_p2 = scmp.lt.s32.totalorder %s838_s27, %s832_s17 }
  0x20   : > { %764 = vmatmul.mubr.msk.f32.gmra.mrb[2].mxu0 %vm322_vm0, %v316_v7 }
  0x21   : > { %770 = vmatmul.mubr.msk.f32.gmra.mrb[2].mxu1 %vm322_vm0, %v320_v8  ;;  %v470_v20 = vcombine.high %v468_v18, %v468_v18  ;;  %v491_v21 = vrot.slane %v469_v19, %v460_v15  ;;  %v484_v25 = vrot.slane %v468_v18, %v460_v15  ;;  %v507_v31 = vrot.slane %v477_v24, %v506_v22  ;;  %p834_p13 = pnand %p833_p12, %p986_p4  ;;  %p841_p3 = por %p840_p2, %p839_p1 }
  0x22   : > { %v499_v33 = vcombine.high %v477_v24, %v477_v24 }
  0x23   : > { %v498_v23 = vrot.slane %v470_v20, %v460_v15  ;;  %v511_v26 = vrot.slane %v491_v21, %v506_v22  ;;  %v501_v28 = vcombine.high %v491_v21, %v491_v21  ;;  %v523_v32 = vrot.slane %v484_v25, %v506_v22  ;;  %p835_p0 = pneg %p834_p13 }
  0x24   : > { %v500_v34 = vcombine.high %v484_v25, %v484_v25  ;;  %v544_v39 = vadd.f32 %v507_v31, %v503_v30  ;;  %v515_v41 = vrot.slane %v499_v33, %v506_v22 }
  0x25   : > { %v527_v27 = vrot.slane %v498_v23, %v506_v22  ;;  %v502_v29 = vcombine.high %v498_v23, %v498_v23  ;;  %v545_v35 = vadd.f32 %v511_v26, %v503_v30  ;;  %v519_v37 = vrot.slane %v501_v28, %v506_v22  ;;  %p842_p5 = pnand %p841_p3, %p835_p0 }
  0x26   : > { %v548_v40 = vadd.f32 %v523_v32, %v503_v30  ;;  %v531_v42 = vrot.slane %v500_v34, %v506_v22  ;;  %v546_v54 = vadd.f32 %v515_v41, %v503_v30 }
  0x27   : > { %v549_v36 = vadd.f32 %v527_v27, %v503_v30  ;;  %v535_v38 = vrot.slane %v502_v29, %v506_v22  ;;  %v547_v49 = vadd.f32 %v519_v37, %v503_v30 }
  0x28   : > { %v550_v55 = vadd.f32 %v531_v42, %v503_v30 }
  0x29   : > { %v551_v50 = vadd.f32 %v535_v38, %v503_v30 }
  0xef   : > { %v762_v43 = vpop.f32.mrb[0].mxu0 }
  0xf0   : > { %v768_v44 = vpop.f32.mrb[0].mxu1  ;;  %v553_v45 = vadd.f32 %v762_v43, %v545_v35  ;;  %v413_v47 = vpop.f32.mrb[1].mxu0 }
  0xf1   : > { %v557_v46 = vadd.f32 %v768_v44, %v549_v36  ;;  %v433_v48 = vpop.f32.mrb[1].mxu1  ;;  %v552_v52 = vadd.f32 %v544_v39, %v413_v47 }
  0xf2   : > { %v556_v53 = vadd.f32 %v548_v40, %v433_v48  ;;  %v561_v56 = vmax.f32 %v553_v45, 0.0 }
  0xf3   : > { %v565_v57 = vmax.f32 %v557_v46, 0.0  ;;  %v560_v58 = vmax.f32 %v552_v52, 0.0  ;;  %v765_v60 = vpop.f32.mrb[2].mxu0 }
  0xf4   : > { %v564_v59 = vmax.f32 %v556_v53, 0.0  ;;  %v771_v61 = vpop.f32.mrb[2].mxu1  ;;  %v576_v62 = vmul.f32 %v741_v51, %v561_v56  ;;  %v555_v0 = vadd.f32 %v765_v60, %v547_v49  ;;  %v423_v2 = vpop.f32.mrb[3].mxu0 }
  0xf5   : > { %v580_v63 = vmul.f32 %v741_v51, %v565_v57  ;;  %v559_v1 = vadd.f32 %v771_v61, %v551_v50  ;;  %v443_v3 = vpop.f32.mrb[3].mxu1  ;;  %v575_v4 = vmul.f32 %v741_v51, %v560_v58  ;;  %v554_v6 = vadd.f32 %v546_v54, %v423_v2 }
  0xf6   : > { %v579_v5 = vmul.f32 %v741_v51, %v564_v59  ;;  %v558_v7 = vadd.f32 %v550_v55, %v443_v3  ;;  %585 = vst.msk [vmem:[%s287_s12 + $0x8] sm:$0xff] %vm583_vm1, %v576_v62  ;;  %v563_v8 = vmax.f32 %v555_v0, 0.0 }
  0xf7   : > { %589 = vst.msk [vmem:[%s287_s12 + $0x28] sm:$0xff] %vm583_vm1, %v580_v63  ;;  %v567_v9 = vmax.f32 %v559_v1, 0.0  ;;  %584 = vst.msk [vmem:[%s287_s12] sm:$0xff] %vm583_vm1, %v575_v4  ;;  %v562_v10 = vmax.f32 %v554_v6, 0.0 }
  0xf8   : > { %588 = vst.msk [vmem:[%s287_s12 + $0x20] sm:$0xff] %vm583_vm1, %v579_v5  ;;  %v566_v11 = vmax.f32 %v558_v7, 0.0  ;;  %v578_v12 = vmul.f32 %v741_v51, %v563_v8 }
  0xf9   : > { %v582_v13 = vmul.f32 %v741_v51, %v567_v9  ;;  %v577_v14 = vmul.f32 %v741_v51, %v562_v10 }
  0xfa   : > { %v581_v15 = vmul.f32 %v741_v51, %v566_v11  ;;  %587 = vst.msk [vmem:[%s287_s12 + $0x18] sm:$0xff] %vm583_vm1, %v578_v12 }
  0xfb   : > { %591 = vst.msk [vmem:[%s287_s12 + $0x38] sm:$0xff] %vm583_vm1, %v582_v13  ;;  %586 = vst.msk [vmem:[%s287_s12 + $0x10] sm:$0xff] %vm583_vm1, %v577_v14 }
  0xfc   : > { %590 = vst.msk [vmem:[%s287_s12 + $0x30] sm:$0xff] %vm583_vm1, %v581_v15 }
  0xfd   : > { %845 = shalt.err (!%p842_p5)
}
  0xfe   : > { %s846_s29 = scalar_lea.hbm %s1045_s15, 1024  ;;  %s850_s10 = scalar_lea.hbm %s1106_s5, 2048 }
  0xff   : > { %p847_p6 = scmp.ne.s32.totalorder %s1045_s15, %s846_s29  ;;  %p851_p10 = scmp.lt.u32.totalorder %s1045_s15, %s1106_s5 }
 0x100   : > { %p852_p11 = scmp.lt.u32.totalorder %s850_s10, %s846_s29  ;;  %p854_p13 = scmp.lt.u32.totalorder %s846_s29, %s1045_s15 }
 0x101   : > { %p848_p7 = pnand %p847_p6, %p986_p4 }
 0x102   : > { %p853_p12 = por %p852_p11, %p851_p10 }
 0x103   : > { %p849_p9 = pneg %p848_p7 }
 0x104   : > { %p855_p0 = por %p854_p13, %p853_p12 }
 0x106   : > { %p856_p1 = pnand %p855_p0, %p849_p9 }
 0x108   : > { %859 = shalt.err (!%p856_p1)
}
 0x109   : > { %s914_s12 = smov 128   ;;  %s915_s14 = smov 8  }
 0x10a   : > { %774 = dma.vmem_to_hbm [thread:$0]  (%p986_p4), %s1047_s13, 1024, %s1045_s15, %s1055_s16, %s914_s12, %s914_s12, %s915_s14  }
 0x10b PF: > { %p780_p2 = scmp.ge.s32.totalorder %s910_s23, 2  ;;  %s623_s21 = sand.u32 1, %s890_s18  }
 0x10c   : > { %s624_s17 = scalar_lea.sflag [#allocation3], %s623_s21 }
 0x10d   : > { %p777_p3 = pnand %p780_p2, %p993_p8 }
 0x10f   : > { %885 = dma.done.wait (!%p777_p3), %s624_s17, 1024  }
 0x110   : > { %887 = vsyncadd (!%p777_p3), %s624_s17, 4294966272  ;;  %s18_s23 = sadd.s32 1, %s910_s23   ;;  %s1109_s18 = smov %s894_s19 }
 0x111   : > { %p15_p5 = scmp.ge.s32.totalorder %s18_s23, 4   ;;  %s1110_s19 = smov %s898_s20 }
 0x112   : > { %s1111_s20 = smov %s999_s6  ;;  %s1112_s21 = smov %s906_s22 }
 0x113   : > { %s1113_s22 = smov %s1115_s26  ;;  %17 = sbr.rel (!%p15_p5) target bundleno = 4 (0x4), region = 84 }
 0x11a   :  { %629 = vsyncpa [#allocation3], 1 }
 0x11b   :  { %631 = vsyncpa [#allocation3 + $0x1], 1 }

</bundles_post_ra>
